<compile_context>
chip_gen: v6e
topology: v6e:2x2x1
jax: 0.10.0
libtpu: 0.0.40
codegen_flags: <defaults>
</compile_context>

<pallas_src>
import functools

import jax
import jax.numpy as jnp
from jax import lax
from jax.experimental import pallas as pl
from jax.experimental.pallas import tpu as pltpu


def _temporal_block_kernel(x_ref, w_ref, b_ref, o_ref, carry_ref, *,
                           kernel_size, dilation, left_padding, apply_relu):
    """Grid = (B, C_out_blocks, L_pad // TILE_L); time axis is innermost/sequential.

    x_ref     : (1, C_in, TILE_L)    current time-tile of the input (NCL layout)
    w_ref     : (TCO, K*C_in)        fused (im2col) weight block, row = out chan,
                                     column index = k*C_in + c_in
    b_ref     : (TCO, 1)             bias (f32), broadcasts along lanes
    o_ref     : (1, TCO, TILE_L)     output tile
    carry_ref : (C_in, max(P, 1))    VMEM scratch: last P = left_padding input
                                     columns seen so far (causal halo carry)
    """
    t = pl.program_id(2)
    K = kernel_size
    P = left_padding
    tile_l = x_ref.shape[2]

    cur = x_ref[0]                                            # (C_in, TILE_L)

    if P > 0:
        # Zero the causal halo at the start of every sequence sweep.
        @pl.when(t == 0)
        def _():
            carry_ref[...] = jnp.zeros_like(carry_ref)

        xx = jnp.concatenate([carry_ref[...], cur], axis=-1)  # (C_in, P + TILE_L)
    else:
        xx = cur

    # Build the fused tap stack exactly once: (K*C_in, TILE_L), rows ordered
    # k-major then c_in to match w_ref's column layout.
    if K > 1:
        taps = []
        for k in range(K):                    # K small & static -> fully unrolled
            start = P - (K - 1 - k) * dilation  # static slice start, in [0, P]
            taps.append(xx[:, start:start + tile_l])
        x_stack = jnp.concatenate(taps, axis=0)               # (K*C_in, TILE_L)
    else:
        x_stack = xx[:, P:P + tile_l]

    # Single MXU matmul over the K*C_in-deep contraction, f32 accumulation.
    acc = jnp.dot(w_ref[...], x_stack, preferred_element_type=jnp.float32)
    acc = acc + b_ref[...]                    # (TCO, 1) broadcast along lanes, f32
    if apply_relu:
        acc = jnp.maximum(acc, 0.0)
    # TODO(synk): nn.Dropout is identity in eval mode; training-mode dropout
    # (pltpu.prng_random_bits mask) is not emitted here.
    o_ref[0] = acc.astype(o_ref.dtype)

    if P > 0:
        # The tail of this window is the halo for the next time-tile.
        # (Correct even when P > TILE_L: these are the last P columns seen.)
        carry_ref[...] = xx[:, tile_l:]


def _round_up(x, m):
    return -(-x // m) * m


def _pick_tile_l(L, per_lane_bytes, target, tile_budget_bytes=24 << 20):
    """Largest 128-aligned tile <= target that keeps pipelined tiles in budget."""
    if L <= 128:
        return L  # single full-extent tile (block == array dims is allowed)
    max_by_vmem = max(128, (tile_budget_bytes // max(per_lane_bytes, 1)) // 128 * 128)
    t = min(_round_up(max(target, 128), 128), max_by_vmem, _round_up(L, 128))
    return max(t, 128)


def temporal_block_forward(x_ncl, weight_v, weight_g, bias, *,
                           kernel_size, dilation, apply_relu=False,
                           compute_dtype=None, tile_l_target=2048,
                           num_cout_blocks=1):
    """Forward pass of TemporalBlock (eval mode).

    x_ncl    : (B, C_in, L)       -- PyTorch Conv1d layout (kept end-to-end)
    weight_v : (C_out, C_in, K)   -- weight_norm "v"
    weight_g : (C_out,)           -- weight_norm "g"
    bias     : (C_out,)
    returns  : (B, C_out, L)

    num_cout_blocks > 1 adds a parallel C_out-split grid axis (useful on v7x
    megacore when B is small); requires C_out % num_cout_blocks == 0 and the
    resulting block to be a multiple of 8.
    """
    B, C_in, L = x_ncl.shape
    C_out = weight_v.shape[0]
    K = kernel_size
    left_padding = (K - 1) * dilation

    x = x_ncl if compute_dtype is None else x_ncl.astype(compute_dtype)
    dt = x.dtype
    itemsize = jnp.dtype(dt).itemsize

    # weight_norm (dim=0 default): w = g * v / ||v||, norm over (C_in, K) per out
    # channel. Math in f32; fused (im2col) layout so ONE matmul covers all taps.
    v32 = weight_v.astype(jnp.float32)
    v_norm = jnp.sqrt(jnp.sum(v32 ** 2, axis=(1, 2), keepdims=True))
    w_eff = weight_g.astype(jnp.float32)[:, None, None] * v32 / v_norm   # (C_out, C_in, K)
    w_flat = jnp.transpose(w_eff, (0, 2, 1)).reshape(C_out, K * C_in).astype(dt)
    b_col = bias.astype(jnp.float32).reshape(C_out, 1)                   # f32 epilogue

    # Optional C_out split (v7x megacore). Block must be sublane-aligned.
    if (num_cout_blocks > 1 and C_out % num_cout_blocks == 0
            and (C_out // num_cout_blocks) % 8 == 0):
        tco = C_out // num_cout_blocks
    else:
        tco = C_out
    n_co = C_out // tco

    # Time-axis tiling derived from the actual pipelined VMEM footprint.
    per_lane_bytes = 2 * (C_in + tco) * itemsize        # double-buffered x + out tiles
    TILE_L = _pick_tile_l(L, per_lane_bytes, tile_l_target)
    L_pad = _round_up(L, TILE_L)
    if L_pad != L:
        x = jnp.pad(x, ((0, 0), (0, 0), (0, L_pad - L)))  # trailing zeros, trimmed below
    T = L_pad // TILE_L
    carry_w = max(left_padding, 1)

    # Right-sized VMEM request: only raise above the default when tiles need it.
    footprint = (2 * (C_in + tco) * TILE_L * itemsize     # pipelined x/out tiles
                 + 2 * tco * K * C_in * itemsize          # resident fused weights
                 + 2 * tco * 4                            # bias
                 + C_in * carry_w * itemsize)             # carry scratch
    needed = 2 * footprint + (4 << 20)
    cp_kwargs = dict(dimension_semantics=("parallel", "parallel", "arbitrary"))
    if needed > (32 << 20):
        cp_kwargs["vmem_limit_bytes"] = int(min(64 << 20, needed))

    kernel = functools.partial(
        _temporal_block_kernel, kernel_size=K, dilation=dilation,
        left_padding=left_padding, apply_relu=apply_relu)

    out = pl.pallas_call(
        kernel,
        out_shape=jax.ShapeDtypeStruct((B, C_out, L_pad), dt),
        grid_spec=pltpu.PrefetchScalarGridSpec(
            num_scalar_prefetch=0,
            grid=(B, n_co, T),
            in_specs=[
                pl.BlockSpec((1, C_in, TILE_L), lambda b, co, t: (b, 0, t)),
                pl.BlockSpec((tco, K * C_in), lambda b, co, t: (co, 0)),   # resident
                pl.BlockSpec((tco, 1), lambda b, co, t: (co, 0)),          # resident
            ],
            out_specs=pl.BlockSpec((1, tco, TILE_L), lambda b, co, t: (b, co, t)),
            scratch_shapes=[pltpu.VMEM((C_in, carry_w), dt)],
        ),
        compiler_params=pltpu.CompilerParams(**cp_kwargs),
    )(x, w_flat, b_col)

    if L_pad != L:
        out = out[:, :, :L]
    return out


def _reference_forward(x_ncl, weight_v, weight_g, bias, *, kernel_size, dilation,
                       apply_relu=False):
    """Plain-JAX reference (lax conv) for correctness checking."""
    left_padding = (kernel_size - 1) * dilation
    v32 = weight_v.astype(jnp.float32)
    v_norm = jnp.sqrt(jnp.sum(v32 ** 2, axis=(1, 2), keepdims=True))
    w_eff = weight_g.astype(jnp.float32)[:, None, None] * v32 / v_norm
    x_pad = jnp.pad(x_ncl.astype(jnp.float32), ((0, 0), (0, 0), (left_padding, 0)))
    y = lax.conv_general_dilated(
        x_pad, w_eff, window_strides=(1,), padding="VALID",
        rhs_dilation=(dilation,), dimension_numbers=("NCH", "OIH", "NCH"))
    y = y + bias.astype(jnp.float32)[None, :, None]
    if apply_relu:
        y = jnp.maximum(y, 0.0)
    return y


if __name__ == "__main__":
    key = jax.random.PRNGKey(0)

    def make_params(k, c_in, c_out, ksz):
        kv, kb = jax.random.split(k)
        # init_weights(): weight ~ N(0, 0.01); weight_norm init: g = ||v|| so w == v.
        weight_v = 0.01 * jax.random.normal(kv, (c_out, c_in, ksz), jnp.float32)
        weight_g = jnp.sqrt(jnp.sum(weight_v ** 2, axis=(1, 2)))
        bias = 0.1 * jax.random.normal(kb, (c_out,), jnp.float32)
        return weight_v, weight_g, bias

    # --- case 1: tiny module-like shapes, single L tile, no activation ---
    B, C_IN, C_OUT, L, K, DIL = 2, 4, 8, 16, 3, 2
    k1, k2, key = jax.random.split(key, 3)
    x = jax.random.normal(k1, (B, C_IN, L), jnp.float32)
    wv, wg, b = make_params(k2, C_IN, C_OUT, K)
    out = jax.block_until_ready(
        temporal_block_forward(x, wv, wg, b, kernel_size=K, dilation=DIL))
    ref = _reference_forward(x, wv, wg, b, kernel_size=K, dilation=DIL)
    assert out.shape == (B, C_OUT, L), out.shape
    assert jnp.allclose(out, ref, atol=1e-5, rtol=1e-5), \
        f"max abs err {jnp.max(jnp.abs(out - ref))}"

    # --- case 2: multi-tile along L (exercises the causal carry) + ReLU ---
    B2, C_IN2, C_OUT2, L2, K2, DIL2 = 2, 8, 16, 512, 3, 4
    k3, k4, key = jax.random.split(key, 3)
    x2 = jax.random.normal(k3, (B2, C_IN2, L2), jnp.float32)
    wv2, wg2, b2 = make_params(k4, C_IN2, C_OUT2, K2)
    out2 = jax.block_until_ready(
        temporal_block_forward(x2, wv2, wg2, b2, kernel_size=K2, dilation=DIL2,
                               apply_relu=True, tile_l_target=128))
    ref2 = _reference_forward(x2, wv2, wg2, b2, kernel_size=K2, dilation=DIL2,
                              apply_relu=True)
    assert out2.shape == (B2, C_OUT2, L2), out2.shape
    assert jnp.allclose(out2, ref2, atol=1e-4, rtol=1e-4), \
        f"max abs err {jnp.max(jnp.abs(out2 - ref2))}"

    # --- case 3: bf16 activations/weights with f32 accumulation ---
    out3 = jax.block_until_ready(
        temporal_block_forward(x2, wv2, wg2, b2, kernel_size=K2, dilation=DIL2,
                               apply_relu=True, tile_l_target=128,
                               compute_dtype=jnp.bfloat16))
    assert out3.dtype == jnp.bfloat16
    assert jnp.allclose(out3.astype(jnp.float32), ref2, atol=5e-2, rtol=5e-2), \
        f"max abs err {jnp.max(jnp.abs(out3.astype(jnp.float32) - ref2))}"

    # --- case 4: B=1 with C_out-split grid axis (v7x megacore path) + ragged L ---
    B4, C_IN4, C_OUT4, L4, K4, DIL4 = 1, 8, 16, 200, 3, 4   # L not a multiple of 128
    k5, k6 = jax.random.split(key)
    x4 = jax.random.normal(k5, (B4, C_IN4, L4), jnp.float32)
    wv4, wg4, b4 = make_params(k6, C_IN4, C_OUT4, K4)
    out4 = jax.block_until_ready(
        temporal_block_forward(x4, wv4, wg4, b4, kernel_size=K4, dilation=DIL4,
                               apply_relu=True, tile_l_target=128,
                               num_cout_blocks=2))
    ref4 = _reference_forward(x4, wv4, wg4, b4, kernel_size=K4, dilation=DIL4,
                              apply_relu=True)
    assert out4.shape == (B4, C_OUT4, L4), out4.shape
    assert jnp.allclose(out4, ref4, atol=1e-4, rtol=1e-4), \
        f"max abs err {jnp.max(jnp.abs(out4 - ref4))}"

    print("KERNEL_OK")
</pallas_src>

<mosaic_0001>
module attributes {stable_mosaic.version = 11 : i64} {
  func.func @_temporal_block_kernel(%arg0: i32, %arg1: i32, %arg2: i32, %arg3: memref<1x4x16xf32, #tpu.memory_space<vmem>>, %arg4: memref<8x12xf32, #tpu.memory_space<vmem>>, %arg5: memref<8x1xf32, #tpu.memory_space<vmem>>, %arg6: memref<1x8x16xf32, #tpu.memory_space<vmem>>, %arg7: memref<4x4xf32, #tpu.memory_space<vmem>>) attributes {dimension_semantics = [#tpu.dimension_semantics<parallel>, #tpu.dimension_semantics<parallel>, #tpu.dimension_semantics<arbitrary>], iteration_bounds = array<i64: 2, 1, 1>, scalar_prefetch = 0 : i64, scratch_operands = 1 : i64, tpu.core_type = #tpu.core_type<tc>, window_params = [{transform_indices = @transform_0, window_bounds = array<i64: 1, 4, 16>}, {transform_indices = @transform_1, window_bounds = array<i64: 8, 12>}, {transform_indices = @transform_2, window_bounds = array<i64: 8, 1>}, {transform_indices = @transform_3, window_bounds = array<i64: 1, 8, 16>}]} {
    %c0 = arith.constant 0 : index
    %c0_0 = arith.constant 0 : index
    %c0_1 = arith.constant 0 : index
    %0 = vector.load %arg3[%c0, %c0_0, %c0_1] : memref<1x4x16xf32, #tpu.memory_space<vmem>>, vector<1x4x16xf32>
    %1 = vector.shape_cast %0 : vector<1x4x16xf32> to vector<4x16xf32>
    %c0_i32 = arith.constant 0 : i32
    %2 = arith.cmpi eq, %arg2, %c0_i32 : i32
    %3 = arith.extui %2 : i1 to i32
    %c0_i32_2 = arith.constant 0 : i32
    %4 = arith.cmpi ne, %3, %c0_i32_2 : i32
    scf.if %4 {
      %cst_14 = arith.constant 0.000000e+00 : f32
      %21 = vector.broadcast %cst_14 : f32 to vector<4x4xf32>
      %c0_15 = arith.constant 0 : index
      %c0_16 = arith.constant 0 : index
      %22 = vector.load %arg7[%c0_15, %c0_16] : memref<4x4xf32, #tpu.memory_space<vmem>>, vector<4x4xf32>
      tpu.vector_store %arg7[%c0_15, %c0_16], %21 {strides = array<i32>} : memref<4x4xf32, #tpu.memory_space<vmem>>, vector<4x4xf32>,
    } else {
    }
    %c0_3 = arith.constant 0 : index
    %c0_4 = arith.constant 0 : index
    %5 = vector.load %arg7[%c0_3, %c0_4] : memref<4x4xf32, #tpu.memory_space<vmem>>, vector<4x4xf32>
    %6 = tpu.concatenate %5, %1 in 1 : vector<4x4xf32>, vector<4x16xf32> -> vector<4x20xf32>
    %7 = vector.extract_strided_slice %6 {offsets = [0, 0], sizes = [4, 16], strides = [1, 1]} : vector<4x20xf32> to vector<4x16xf32>
    %8 = vector.extract_strided_slice %6 {offsets = [0, 2], sizes = [4, 16], strides = [1, 1]} : vector<4x20xf32> to vector<4x16xf32>
    %9 = vector.extract_strided_slice %6 {offsets = [0, 4], sizes = [4, 16], strides = [1, 1]} : vector<4x20xf32> to vector<4x16xf32>
    %10 = tpu.concatenate %7, %8, %9 in 0 : vector<4x16xf32>, vector<4x16xf32>, vector<4x16xf32> -> vector<12x16xf32>
    %c0_5 = arith.constant 0 : index
    %c0_6 = arith.constant 0 : index
    %11 = vector.load %arg4[%c0_5, %c0_6] : memref<8x12xf32, #tpu.memory_space<vmem>>, vector<8x12xf32>
    %cst = arith.constant dense<0.000000e+00> : vector<8x16xf32>
    %12 = tpu.matmul %11, %10, %cst {dimension_numbers = #tpu.dot_dimension_numbers<[1], [0], [0], [1], [0, 0, 1, 1], [], []>} : vector<8x12xf32>, vector<12x16xf32>, vector<8x16xf32> -> vector<8x16xf32>
    %c0_7 = arith.constant 0 : index
    %c0_8 = arith.constant 0 : index
    %13 = vector.load %arg5[%c0_7, %c0_8] : memref<8x1xf32, #tpu.memory_space<vmem>>, vector<8x1xf32>
    %14 = vector.broadcast %13 : vector<8x1xf32> to vector<8x16xf32>
    %15 = arith.addf %12, %14 : vector<8x16xf32>
    %c0_9 = arith.constant 0 : index
    %c0_10 = arith.constant 0 : index
    %c0_11 = arith.constant 0 : index
    %16 = vector.load %arg6[%c0_9, %c0_10, %c0_11] : memref<1x8x16xf32, #tpu.memory_space<vmem>>, vector<1x8x16xf32>
    %17 = vector.shape_cast %16 : vector<1x8x16xf32> to vector<8x16xf32>
    %18 = vector.shape_cast %15 : vector<8x16xf32> to vector<1x8x16xf32>
    tpu.vector_store %arg6[%c0_9, %c0_10, %c0_11], %18 {strides = array<i32>} : memref<1x8x16xf32, #tpu.memory_space<vmem>>, vector<1x8x16xf32>,
    %19 = vector.extract_strided_slice %6 {offsets = [0, 16], sizes = [4, 4], strides = [1, 1]} : vector<4x20xf32> to vector<4x4xf32>
    %c0_12 = arith.constant 0 : index
    %c0_13 = arith.constant 0 : index
    %20 = vector.load %arg7[%c0_12, %c0_13] : memref<4x4xf32, #tpu.memory_space<vmem>>, vector<4x4xf32>
    tpu.vector_store %arg7[%c0_12, %c0_13], %19 {strides = array<i32>} : memref<4x4xf32, #tpu.memory_space<vmem>>, vector<4x4xf32>,
    return
  }
  func.func @transform_0(%arg0: i32, %arg1: i32, %arg2: i32) -> (i32, i32, i32) {
    %c0_i32 = arith.constant 0 : i32
    %c0_i32_0 = arith.constant 0 : i32
    return %arg0, %c0_i32, %arg2 : i32, i32, i32
  }
  func.func @transform_1(%arg0: i32, %arg1: i32, %arg2: i32) -> (i32, i32) {
    %c0_i32 = arith.constant 0 : i32
    %c0_i32_0 = arith.constant 0 : i32
    return %arg1, %c0_i32 : i32, i32
  }
  func.func @transform_2(%arg0: i32, %arg1: i32, %arg2: i32) -> (i32, i32) {
    %c0_i32 = arith.constant 0 : i32
    %c0_i32_0 = arith.constant 0 : i32
    return %arg1, %c0_i32 : i32, i32
  }
  func.func @transform_3(%arg0: i32, %arg1: i32, %arg2: i32) -> (i32, i32, i32) {
    %c0_i32 = arith.constant 0 : i32
    return %arg0, %arg1, %arg2 : i32, i32, i32
  }
}

</mosaic_0001>

<bundles_post_ra>
// kernel: tpu_custom_call.1
= control target key start
LH: loop header
LB: loop body
LE: loop exit
PB: predicated region body
PF: predicated region fallthrough
CT: control target
= control target key end

     0   :  { %8 = vsyncpa [#allocation4], 0  ;;  %s839_s0 = inlined_call_operand.vmem [shape: f32[2,4,16], index: 0, kind: input, shape index: {}]   ;;  %s840_s1 = inlined_call_operand.hbm [shape: f32[8,12], index: 1, kind: input, shape index: {}]   ;;  %s841_s2 = inlined_call_operand.vmem [shape: f32[8,1], index: 2, kind: input, shape index: {}]   ;;  %s842_s3 = inlined_call_operand.hbm [shape: f32[2,8,16], index: 3, kind: output, shape index: {}]  }
   0x1   :  { %9 = vsyncpa [#allocation5], 0 }
   0x2   :  { %11 = vsyncpa [#allocation5 + $0x1], 0  ;;  %s708_s12 = smov 0   ;;  %s710_s13 = smov 0  }
   0x3   :  { %s712_s14 = smov 0   ;;  %s714_s15 = smov 0  }
   0x4   :  { %s716_s16 = smov 0   ;;  %s718_s17 = smov 0  }
   0x5 LB: > { %s470_s18 = sadd.s32 4294967295, %s677_s17   ;;  %s471_s19 = sadd.s32 4294967294, %s677_s17   ;;  %s677_s17 = sphi %s718_s17, %s17_s17   ;;  %s673_s16 = sphi %s716_s16, %s851_s16   ;;  %s669_s15 = sphi %s714_s15, %s850_s15   ;;  %s665_s14 = sphi %s712_s14, %s849_s14   ;;  %s661_s13 = sphi %s710_s13, %s848_s13   ;;  %s657_s12 = sphi %s708_s12, %s847_s12  }
   0x6   : > { %s36_s20 = sadd.s32 1, %s673_s16  ;;  %s127_s21 = sadd.s32 1, %s665_s14 }
   0x7   : > { %p38_p0 = scmp.ge.s32.totalorder %s36_s20, 2  ;;  %p137_p1 = scmp.ne.s32.totalorder %s665_s14, %s661_s13 }
   0x8   : > { %p138_p2 = scmp.eq.s32.totalorder %s470_s18, 1  ;;  %p143_p3 = scmp.ne.s32.totalorder %s661_s13, %s657_s12 }
   0x9   : > { %s853_s20 = smov (%p38_p0, %s36_s20), 0  ;;  %p144_p5 = scmp.eq.s32.totalorder %s471_s19, 1 }
   0xa   : > { %p748_p4 = por %p138_p2, %p137_p1  ;;  %s120_s23 = ssub.s32 %s673_s16, %s853_s20 }
   0xb   : > { %p472_p6 = scmp.ge.s32.totalorder %s677_s17, 1  ;;  %p125_p7 = scmp.eq.s32.totalorder %s120_s23, 0 }
   0xc   : > { %p755_p8 = por %p144_p5, %p143_p3  ;;  %p151_p9 = scmp.lt.s32.totalorder %s677_s17, 3 }
   0xd   : > { %s761_s25 = scalar_select %p125_p7, %s665_s14, %s127_s21  }
   0xe   : > { %p763_p10 = pnand %p472_p6, %p151_p9  ;;  %p767_p11 = scmp.eq.s32.totalorder %s470_s18, 0 }
   0xf   : > { %s679_s28 = smov [#allocation3]  }
  0x10   : > { %p502_p12 = pneg %p763_p10  ;;  %s166_s29 = sshll.u32 %s679_s28, 4  ;;  %s167_s29 = int_to_ptr.vmem [resolvable:$true] %s166_s29 }
  0x11   : > { %s582_s30 = scalar_lea.vmem %s167_s29, 128  ;;  %p590_p5 = scmp.lt.s32.totalorder %s167_s29, %s167_s29 }
  0x12   : > { %p503_p13 = pnand %p767_p11, %p502_p12  ;;  %p583_p1 = scmp.ne.s32.totalorder %s167_s29, %s582_s30 }
  0x13   : > { %p591_p6 = scmp.lt.s32.totalorder %s582_s30, %s582_s30 }
  0x14   : > { %p573_p0 = pneg %p503_p13 }
  0x15   : > { %p592_p7 = por %p591_p6, %p590_p5 }
  0x16   : > { %p585_p2 = pnand %p583_p1, %p573_p0 }
  0x18   : > { %p586_p3 = pneg %p585_p2 }
  0x1a   : > { %p593_p9 = pnand %p592_p7, %p586_p3 }
  0x1c   : > { %596 = shalt.err (!%p593_p9)
}
  0x1d   : > { %505 = dma.hbm_to_vmem [thread:$0]  (!%p503_p13), %s840_s1, 128, %s167_s29, [#allocation4]  }
  0x1e   : > { %196 = sbr.rel (%p763_p10) target bundleno = 486 (0x1e6), region = 32 }
  0x23   : > { %648 = dma.done.wait (%p767_p11), [#allocation4], 128  }
  0x24   : > { %650 = vsyncadd (%p767_p11), [#allocation4], 4294967168  ;;  %vm242_vm0 = vcmask 27648   ;;  %p226_p12 = scmp.lt.s32.totalorder %s669_s15, 1  ;;  %v680_v0 = vmov 0.0   ;;  %s681_s11 = smov 4  }
  0x25   : > { %243 = vst.msk [vmem:[#allocation2] sm:$0xf] %vm242_vm0, %v680_v0  ;;  %489 = vmatprep.subr.mxu0 %v680_v0  ;;  %vm682_vm1 = vmmov 0   ;;  %v683_v2 = vmov 0   ;;  %vm249_vm2 = vcmask 31744   ;;  %s684_s18 = smov 124  }
  0x26   : > { %s227_s6 = scalar_select %p226_p12, %s669_s15, 1  ;;  %493 = vmatprep.mubr.msk.f32.mxu0 %vm682_vm1, %v680_v0  ;;  %569 = vset.pattern.permute.xlu1 %v683_v2  ;;  %v261_v7 = vld [vmem:[%s841_s2] sm:$0xff]  ;;  %vm258_vm3 = vcmask 1043456   ;;  %vm267_vm4 = vcmask 97280   ;;  %vm343_vm5 = vcmask 130048  }
  0x27   : > { %570 = vset.pattern.permute.xlu0 %v683_v2  ;;  %s685_s19 = smov 126   ;;  %s686_s26 = smov 112   ;;  %v260_v10 = vld [vmem:[#allocation3] sm:$0xff] }
  0x28   : > { %s479_s7 = sshll.u32 %s227_s6, 2  ;;  %s223_s27 = sand.u32 1, %s661_s13  }
  0x29   : > { %s232_s10 = scalar_lea.vmem %s839_s0, %s479_s7  ;;  %s478_s28 = sshll.u32 %s223_s27, 3 }
  0x2a   : > { %v237_v1 = vld [vmem:[%s232_s10] sm:$0xf]  ;;  %s483_s29 = sshll.u32 %s669_s15, 7  ;;  %s225_s30 = scalar_lea.vmem [#allocation6], %s478_s28 }
  0x2b   : > { %246 = vrot.lane.b32.xlu0 %v237_v1, %s681_s11  ;;  %s366_s4 = sshll.u32 %s225_s30, 4  ;;  %s799_s7 = scalar_lea.hbm %s842_s3, %s483_s29  ;;  %s367_s4 = int_to_ptr.vmem [resolvable:$true] %s366_s4 }
  0x2c   : > { %v244_v3 = vld [vmem:[#allocation2] sm:$0xf]  ;;  %s351_s8 = scalar_lea.sflag [#allocation5], %s223_s27  ;;  %s597_s9 = scalar_lea.vmem %s367_s4, 128 }
  0x2d   : > { %p598_p10 = scmp.ne.s32.totalorder %s367_s4, %s597_s9  ;;  %s687_s15 = smov [#allocation6]  }
  0x2e   : > { %s601_s10 = sshll.u32 %s687_s15, 4  ;;  %s602_s10 = int_to_ptr.vmem [resolvable:$false] %s601_s10 }
  0x2f   : > { %p599_p11 = pnand %p598_p10, %p748_p4  ;;  %s603_s11 = scalar_lea.vmem %s602_s10, 256 }
  0x30   : > { %p604_p0 = scmp.lt.s32.totalorder %s367_s4, %s602_s10  ;;  %p605_p1 = scmp.lt.s32.totalorder %s603_s11, %s597_s9 }
  0x31   : > { %p600_p13 = pneg %p599_p11 }
  0x32   : > { %p606_p2 = por %p605_p1, %p604_p0 }
  0x34   : > { %p607_p3 = pnand %p606_p2, %p600_p13 }
  0x9d   : > { %v247_v4 = vpop.permute.xlu0 %246 }
  0x9e   : > { %v250_v5 = vsel %vm249_vm2, %v244_v3, %v247_v4 }
  0x9f   : > { %256 = vrot.lane.b32.xlu0 %v250_v5, %s684_s18  ;;  %v252_v6 = vrot.slane %v250_v5, 4 }
  0xa1   : > { %253 = vrot.lane.b32.xlu1 %v252_v6, %s685_s19 }
  0xa3   : > { %345 = vrot.lane.b32.xlu0 %v250_v5, %s686_s26 }
  0xa5   : > { %264 = vperm.xlu1 %569, %v261_v7  }
 0x111   : > { %v257_v8 = vpop.permute.xlu0 %256 }
 0x112   : > { %490 = vmatpush3.msk.msra.mxu0 %vm258_vm3, %v257_v8 }
 0x113   : > { %v254_v9 = vpop.permute.xlu1 %253  ;;  %491 = vmatprep.subr.mxu0 %v680_v0 }
 0x114   : > { %v259_v11 = vsel %vm258_vm3, %v250_v5, %v254_v9 }
 0x115   : > { %v346_v12 = vpop.permute.xlu0 %345  ;;  %492 = vmatpush3.msra.mxu0 %v259_v11 }
 0x116   : > { %349 = vst.msk [vmem:[#allocation2] sm:$0xf] %vm242_vm0, %v346_v12  ;;  %494 = vmatmul.mubr.msk.f32.vlgmr.msra.gmra.mxu0 %vm267_vm4, %v260_v10 }
 0x120   : > { %v265_v13 = vpop.permute.xlu1 %264 }
 0x1d6   : > { %v339_v14 = vpop.f32.mrf.mxu0 }
 0x1d7   : > { %v340_v15 = vadd.f32 %v339_v14, %v265_v13 }
 0x1d8   : > { %v495_v16 = vpop.f32.mrf.mxu0 }
 0x1d9   : > { %344 = vst.msk [vmem:[%s225_s30] sm:$0xff] %vm343_vm5, %v340_v15 }
 0x1da   : > { %610 = shalt.err (!%p607_p3)
}
 0x1db   : > { %s611_s18 = scalar_lea.hbm %s799_s7, 128  ;;  %s615_s23 = scalar_lea.hbm %s842_s3, 256 }
 0x1dc   : > { %p612_p5 = scmp.ne.s32.totalorder %s799_s7, %s611_s18  ;;  %p616_p9 = scmp.lt.s32.totalorder %s799_s7, %s842_s3 }
 0x1dd   : > { %p617_p12 = scmp.lt.s32.totalorder %s615_s23, %s611_s18 }
 0x1de   : > { %p613_p6 = pnand %p612_p5, %p748_p4 }
 0x1df   : > { %p618_p10 = por %p617_p12, %p616_p9 }
 0x1e0   : > { %p614_p7 = pneg %p613_p6 }
 0x1e2   : > { %p619_p11 = pnand %p618_p10, %p614_p7 }
 0x1e4   : > { %622 = shalt.err (!%p619_p11)
}
 0x1e5   : > { %500 = dma.vmem_to_hbm [thread:$0]  (%p748_p4), %s367_s4, 128, %s799_s7, %s351_s8  }
 0x1e6 PF: > { %p512_p13 = scmp.ge.s32.totalorder %s677_s17, 2  ;;  %s378_s28 = sand.u32 1, %s657_s12  }
 0x1e7   : > { %s379_s29 = scalar_lea.sflag [#allocation5], %s378_s28 }
 0x1e8   : > { %p507_p0 = pnand %p512_p13, %p755_p8 }
 0x1ea   : > { %p508_p1 = pneg %p507_p0 }
 0x1ec   : > { %652 = dma.done.wait (%p508_p1), %s379_s29, 128  }
 0x1ed   : > { %654 = vsyncadd (%p508_p1), %s379_s29, 4294967168  ;;  %s17_s17 = sadd.s32 1, %s677_s17   ;;  %s847_s12 = smov %s661_s13 }
 0x1ee   : > { %p14_p2 = scmp.ge.s32.totalorder %s17_s17, 4   ;;  %s848_s13 = smov %s665_s14 }
 0x1ef   : > { %s849_s14 = smov %s761_s25  ;;  %s850_s15 = smov %s673_s16 }
 0x1f0   : > { %s851_s16 = smov %s853_s20  ;;  %16 = sbr.rel (!%p14_p2) target bundleno = 5 (0x5), region = 80 }
 0x1f5   :  { %384 = vsyncpa [#allocation4], 1 }
 0x1f6   :  { %386 = vsyncpa [#allocation4 + $0x1], 1 }
 0x1f7   :  { %387 = vsyncpa [#allocation5], 1 }
 0x1f8   :  { %389 = vsyncpa [#allocation5 + $0x1], 1 }

</bundles_post_ra>
